<compile_context>
chip_gen: v7x
topology: tpu7x:2x2x1
jax: 0.10.0
libtpu: 0.0.40
codegen_flags: <defaults>
</compile_context>

<pallas_src>
import functools

import jax
import jax.numpy as jnp
from jax.experimental import pallas as pl
from jax.experimental.pallas import tpu as pltpu


def _round_up(x: int, m: int) -> int:
    return ((x + m - 1) // m) * m


# ----------------------------------------------------------------------------
# Kernels: one (tm, tn) output tile, accumulating over the K grid axis.
#   x_ref: (tm, tk)  w_ref: (tk, tn)  [b_ref: (1, tn) f32]  o_ref: (tm, tn)
#   acc_ref: (tm, tn) f32 scratch, resident across the K axis.
# relu(W) is applied on the weight tile right before it feeds the MXU.
# ----------------------------------------------------------------------------
def _pos_linear_kernel_nobias(x_ref, w_ref, o_ref, acc_ref):
    @pl.when(pl.program_id(2) == 0)
    def _():
        acc_ref[...] = jnp.zeros_like(acc_ref)

    acc_ref[...] += jnp.dot(
        x_ref[...],
        jnp.maximum(w_ref[...], 0),            # fused nn.functional.relu(W)
        preferred_element_type=jnp.float32,
    )

    @pl.when(pl.program_id(2) == pl.num_programs(2) - 1)
    def _():
        o_ref[...] = acc_ref[...].astype(o_ref.dtype)


def _pos_linear_kernel_bias(x_ref, w_ref, b_ref, o_ref, acc_ref):
    @pl.when(pl.program_id(2) == 0)
    def _():
        # Fold the bias into the accumulator init (saves an epilogue VPU add).
        acc_ref[...] = jnp.broadcast_to(b_ref[...], acc_ref.shape)

    acc_ref[...] += jnp.dot(
        x_ref[...],
        jnp.maximum(w_ref[...], 0),            # fused nn.functional.relu(W)
        preferred_element_type=jnp.float32,
    )

    @pl.when(pl.program_id(2) == pl.num_programs(2) - 1)
    def _():
        o_ref[...] = acc_ref[...].astype(o_ref.dtype)


# ----------------------------------------------------------------------------
# Wrapper: casts to bf16 (fused with padding), launches the gridded matmul,
# slices back.  Supports arbitrary leading batch dims on x (like torch.matmul).
# ----------------------------------------------------------------------------
@functools.partial(jax.jit, static_argnames=("tm", "tn", "tk", "use_bf16"))
def pos_linear(x, weight, bias=None, *, tm=512, tn=512, tk=512, use_bf16=True):
    orig_dtype = x.dtype
    lead_shape = x.shape[:-1]
    K = x.shape[-1]
    Kw, N = weight.shape
    assert Kw == K, f"in_features mismatch: {Kw} vs {K}"

    compute_dtype = jnp.bfloat16 if use_bf16 else jnp.float32
    sub = 16 if use_bf16 else 8                 # min sublane tile for the dtype

    x2 = x.reshape(-1, K)
    M = x2.shape[0]

    # Clamp tiles to the (padded) problem size; keep (sub, 128) alignment.
    tm = min(tm, _round_up(M, sub))
    tn = min(tn, _round_up(N, 128))
    tk = min(tk, _round_up(K, 128))

    # Megacore guard (v7x has 2 TCs sharded over the parallel axes): if the
    # (i, j) grid collapsed to a single block, split a parallel tile so both
    # cores get work.  No-op on single-TC v5e/v6e.
    if _round_up(M, tm) == tm and _round_up(N, tn) == tn:
        if tm >= 2 * sub and _round_up(M, sub) > sub:
            tm = _round_up(tm // 2, sub)
        elif tn >= 256 and _round_up(N, 128) > 128:
            tn = _round_up(tn // 2, 128)

    Mp, Kp, Np = _round_up(M, tm), _round_up(K, tk), _round_up(N, tn)

    # Cast + pad in one pass each (zero padding is exact: relu(0)=0).
    # For repeated calls, the weight cast/pad is constant and XLA will CSE it
    # under a surrounding jit; callers can also pre-cast W to bf16 themselves.
    x2 = x2.astype(compute_dtype)
    if (Mp, Kp) != (M, K):
        x2 = jnp.pad(x2, ((0, Mp - M), (0, Kp - K)))
    w = weight.astype(compute_dtype)
    if (Kp, Np) != (K, N):
        w = jnp.pad(w, ((0, Kp - K), (0, Np - N)))

    grid = (Mp // tm, Np // tn, Kp // tk)

    in_specs = [
        pl.BlockSpec((tm, tk), lambda i, j, k: (i, k)),
        pl.BlockSpec((tk, tn), lambda i, j, k: (k, j)),
    ]
    operands = [x2, w]
    if bias is not None:
        b = bias.astype(jnp.float32)
        if Np != N:
            b = jnp.pad(b, (0, Np - N))
        operands.append(b.reshape(1, Np))
        in_specs.append(pl.BlockSpec((1, tn), lambda i, j, k: (0, j)))
        kernel = _pos_linear_kernel_bias
    else:
        kernel = _pos_linear_kernel_nobias

    # VMEM budget: double-buffered operands + f32 accumulator + output tiles.
    in_bytes = jnp.dtype(compute_dtype).itemsize
    out_bytes = jnp.dtype(orig_dtype).itemsize
    footprint = (
        2 * (tm * tk + tk * tn) * in_bytes
        + tm * tn * 4
        + 2 * tm * tn * out_bytes
        + (2 * tn * 4 if bias is not None else 0)
    )
    vmem_limit = min(48 * 1024 * 1024, max(2 * footprint, 16 * 1024 * 1024))

    out = pl.pallas_call(
        kernel,
        out_shape=jax.ShapeDtypeStruct((Mp, Np), orig_dtype),
        grid_spec=pltpu.PrefetchScalarGridSpec(
            num_scalar_prefetch=0,
            grid=grid,
            in_specs=in_specs,
            out_specs=pl.BlockSpec((tm, tn), lambda i, j, k: (i, j)),
            scratch_shapes=[pltpu.VMEM((tm, tn), jnp.float32)],
        ),
        compiler_params=pltpu.CompilerParams(
            # M/N parallel -> shard across v7x's 2 TCs; K is the reduction.
            dimension_semantics=("parallel", "parallel", "arbitrary"),
            vmem_limit_bytes=int(vmem_limit),
        ),
    )(*operands)

    out = out[:M, :N]
    return out.reshape(lead_shape + (N,))


# ----------------------------------------------------------------------------
# Module-like container matching the PyTorch constructor semantics.
# ----------------------------------------------------------------------------
class PosLinear:
    def __init__(self, in_features, out_features, input_bias=False, *, key):
        std = (2.0 / (in_features + out_features)) ** 0.5  # xavier_normal gain=1
        self.weight = jnp.abs(
            std * jax.random.normal(key, (in_features, out_features), jnp.float32)
        )
        self.bias = jnp.zeros((out_features,), jnp.float32) if input_bias else None

    def __call__(self, x):
        return pos_linear(x, self.weight, self.bias)


if __name__ == "__main__":
    key = jax.random.PRNGKey(0)
    kx1, kw1, kx2, kw2 = jax.random.split(key, 4)

    # Case 1: small, deliberately unaligned shapes (exercise the padding path).
    B, IN, OUT = 10, 96, 160
    layer = PosLinear(IN, OUT, input_bias=False, key=kw1)
    x = jax.random.normal(kx1, (B, IN), jnp.float32)
    out = layer(x)
    jax.block_until_ready(out)
    ref = x @ jnp.maximum(layer.weight, 0.0)
    assert out.shape == (B, OUT)
    assert out.dtype == x.dtype
    assert jnp.allclose(out, ref, rtol=2e-2, atol=2e-2)

    # Case 2: aligned shapes with a real multi-tile grid, with bias.
    B2, IN2, OUT2 = 256, 512, 384
    layer2 = PosLinear(IN2, OUT2, input_bias=True, key=kw2)
    x2 = jax.random.normal(kx2, (B2, IN2), jnp.float32)
    out2 = layer2(x2)
    jax.block_until_ready(out2)
    ref2 = x2 @ jnp.maximum(layer2.weight, 0.0) + layer2.bias
    assert out2.shape == (B2, OUT2)
    assert jnp.allclose(out2, ref2, rtol=2e-2, atol=2e-2)

    print("KERNEL_OK")
</pallas_src>

<mosaic_0001>
module attributes {stable_mosaic.version = 11 : i64} {
  func.func @_pos_linear_kernel_nobias(%arg0: i32, %arg1: i32, %arg2: i32, %arg3: memref<16x128xbf16, #tpu.memory_space<vmem>>, %arg4: memref<128x128xbf16, #tpu.memory_space<vmem>>, %arg5: memref<16x128xf32, #tpu.memory_space<vmem>>, %arg6: memref<16x128xf32, #tpu.memory_space<vmem>>) attributes {dimension_semantics = [#tpu.dimension_semantics<parallel>, #tpu.dimension_semantics<parallel>, #tpu.dimension_semantics<arbitrary>], iteration_bounds = array<i64: 1, 2, 1>, scalar_prefetch = 0 : i64, scratch_operands = 1 : i64, tpu.core_type = #tpu.core_type<tc>, window_params = [{transform_indices = @transform_0, window_bounds = array<i64: 16, 128>}, {transform_indices = @transform_1, window_bounds = array<i64: 128, 128>}, {transform_indices = @transform_2, window_bounds = array<i64: 16, 128>}]} {
    %c0_i32 = arith.constant 0 : i32
    %0 = arith.cmpi eq, %arg2, %c0_i32 : i32
    %1 = arith.extui %0 : i1 to i32
    %c0_i32_0 = arith.constant 0 : i32
    %2 = arith.cmpi ne, %1, %c0_i32_0 : i32
    scf.if %2 {
      %cst_11 = arith.constant 0.000000e+00 : f32
      %14 = vector.broadcast %cst_11 : f32 to vector<16x128xf32>
      %c0_12 = arith.constant 0 : index
      %c0_13 = arith.constant 0 : index
      %15 = vector.load %arg6[%c0_12, %c0_13] : memref<16x128xf32, #tpu.memory_space<vmem>>, vector<16x128xf32>
      tpu.vector_store %arg6[%c0_12, %c0_13], %14 {strides = array<i32>} : memref<16x128xf32, #tpu.memory_space<vmem>>, vector<16x128xf32>,
    } else {
    }
    %c0 = arith.constant 0 : index
    %c0_1 = arith.constant 0 : index
    %3 = vector.load %arg6[%c0, %c0_1] : memref<16x128xf32, #tpu.memory_space<vmem>>, vector<16x128xf32>
    %c0_2 = arith.constant 0 : index
    %c0_3 = arith.constant 0 : index
    %4 = vector.load %arg3[%c0_2, %c0_3] : memref<16x128xbf16, #tpu.memory_space<vmem>>, vector<16x128xbf16>
    %c0_4 = arith.constant 0 : index
    %c0_5 = arith.constant 0 : index
    %5 = vector.load %arg4[%c0_4, %c0_5] : memref<128x128xbf16, #tpu.memory_space<vmem>>, vector<128x128xbf16>
    %cst = arith.constant 0.000000e+00 : bf16
    %6 = vector.broadcast %cst : bf16 to vector<128x128xbf16>
    %7 = arith.maximumf %5, %6 : vector<128x128xbf16>
    %cst_6 = arith.constant dense<0.000000e+00> : vector<16x128xf32>
    %8 = tpu.matmul %4, %7, %cst_6 {dimension_numbers = #tpu.dot_dimension_numbers<[1], [0], [0], [1], [0, 0, 1, 1], [], []>} : vector<16x128xbf16>, vector<128x128xbf16>, vector<16x128xf32> -> vector<16x128xf32>
    %9 = arith.addf %3, %8 : vector<16x128xf32>
    %c0_7 = arith.constant 0 : index
    %c0_8 = arith.constant 0 : index
    %10 = vector.load %arg6[%c0_7, %c0_8] : memref<16x128xf32, #tpu.memory_space<vmem>>, vector<16x128xf32>
    tpu.vector_store %arg6[%c0_7, %c0_8], %9 {strides = array<i32>} : memref<16x128xf32, #tpu.memory_space<vmem>>, vector<16x128xf32>,
    %c0_i32_9 = arith.constant 0 : i32
    %11 = arith.cmpi eq, %arg2, %c0_i32_9 : i32
    %12 = arith.extui %11 : i1 to i32
    %c0_i32_10 = arith.constant 0 : i32
    %13 = arith.cmpi ne, %12, %c0_i32_10 : i32
    scf.if %13 {
      %c0_11 = arith.constant 0 : index
      %c0_12 = arith.constant 0 : index
      %14 = vector.load %arg6[%c0_11, %c0_12] : memref<16x128xf32, #tpu.memory_space<vmem>>, vector<16x128xf32>
      %c0_13 = arith.constant 0 : index
      %c0_14 = arith.constant 0 : index
      %15 = vector.load %arg5[%c0_13, %c0_14] : memref<16x128xf32, #tpu.memory_space<vmem>>, vector<16x128xf32>
      tpu.vector_store %arg5[%c0_13, %c0_14], %14 {strides = array<i32>} : memref<16x128xf32, #tpu.memory_space<vmem>>, vector<16x128xf32>,
    } else {
    }
    return
  }
  func.func @transform_0(%arg0: i32, %arg1: i32, %arg2: i32) -> (i32, i32) {
    %c0_i32 = arith.constant 0 : i32
    return %arg0, %arg2 : i32, i32
  }
  func.func @transform_1(%arg0: i32, %arg1: i32, %arg2: i32) -> (i32, i32) {
    %c0_i32 = arith.constant 0 : i32
    return %arg2, %arg1 : i32, i32
  }
  func.func @transform_2(%arg0: i32, %arg1: i32, %arg2: i32) -> (i32, i32) {
    %c0_i32 = arith.constant 0 : i32
    return %arg0, %arg1 : i32, i32
  }
}

</mosaic_0001>

<bundles_post_ra>
// kernel: pos_linear.1
= control target key start
LH: loop header
LB: loop body
LE: loop exit
PB: predicated region body
PF: predicated region fallthrough
CT: control target
= control target key end

     0   :  { %7 = vsyncpa [#allocation5], 0  ;;  %s949_s0 = inlined_call_operand.vmem [shape: bf16[16,128], index: 0, kind: input, shape index: {}]   ;;  %s950_s1 = inlined_call_operand.vmem [shape: bf16[128,256], index: 1, kind: input, shape index: {}]   ;;  %s951_s2 = inlined_call_operand.hbm [shape: f32[16,256], index: 2, kind: output, shape index: {}]  }
   0x1   :  { %9 = vsyncpa [#allocation5 + $0x1], 0  ;;  %s786_s9 = smov 0   ;;  %s788_s10 = smov 0  }
   0x2   :  { %s790_s11 = smov 0   ;;  %s792_s12 = smov 0  }
   0x3   :  { %s794_s13 = smov 0   ;;  %s796_s14 = smov 0  }
   0x4 LB: > { %s570_s15 = sadd.s32 4294967295, %s762_s14   ;;  %s571_s16 = sadd.s32 4294967294, %s762_s14   ;;  %s762_s14 = sphi %s796_s14, %s15_s14   ;;  %s758_s13 = sphi %s794_s13, %s958_s13   ;;  %s754_s12 = sphi %s792_s12, %s957_s12   ;;  %s750_s11 = sphi %s790_s11, %s956_s11   ;;  %s746_s10 = sphi %s788_s10, %s955_s10   ;;  %s742_s9 = sphi %s786_s9, %s954_s9  }
   0x5   : > { %s30_s17 = sadd.s32 1, %s758_s13  ;;  %s71_s18 = sadd.s32 1, %s750_s11 }
   0x6   : > { %p32_p0 = scmp.ge.s32.totalorder %s30_s17, 2  ;;  %p78_p1 = scmp.ne.s32.totalorder %s750_s11, %s746_s10 }
   0x7   : > { %p79_p2 = scmp.eq.s32.totalorder %s762_s14, 0  ;;  %p110_p3 = scmp.eq.s32.totalorder %s570_s15, 1 }
   0x8   : > { %s960_s17 = smov (%p32_p0, %s30_s17), 0  ;;  %p115_p6 = scmp.ne.s32.totalorder %s746_s10, %s742_s9 }
   0x9   : > { %p80_p4 = por %p79_p2, %p78_p1  ;;  %p825_p5 = por %p110_p3, %p78_p1 }
   0xa   : > { %s67_s20 = ssub.s32 %s758_s13, %s960_s17  ;;  %p116_p8 = scmp.eq.s32.totalorder %s571_s16, 1 }
   0xb   : > { %p69_p7 = scmp.eq.s32.totalorder %s67_s20, 0  ;;  %p574_p10 = scmp.ge.s32.totalorder %s762_s14, 2 }
   0xc   : > { %p836_p9 = por %p116_p8, %p115_p6 }
   0xd   : > { %s834_s21 = scalar_select %p69_p7, %s750_s11, %s71_s18  }
   0xe   : > { %144 = sbr.rel (%p574_p10) target bundleno = 35 (0x23), region = 20 }
  0x15   : > { %147 = sbr.rel (!%p80_p4) target bundleno = 35 (0x23), region = 24  ;;  %s149_s23 = sand.u32 (%p80_p4), 1, %s750_s11  }
  0x16   : > { %s576_s24 = sshll.u32 (%p80_p4), %s758_s13, 2  ;;  %s575_s25 = sshll.u32 (%p80_p4), %s149_s23, 6 }
  0x17   : > { %s848_s28 = scalar_lea.vmem (%p80_p4), %s950_s1, %s576_s24  ;;  %s151_s29 = scalar_lea.vmem (%p80_p4), [#allocation3], %s575_s25 }
  0x18   : > { %v172_v0 = vld [vmem:[%s848_s28] sm:$0xf] (%p80_p4)  ;;  %v174_v1 = vld [vmem:[%s848_s28 + $0x8] sm:$0xf] (%p80_p4)  ;;  %v176_v2 = vld [vmem:[%s848_s28 + $0x10] sm:$0xf] (%p80_p4) }
  0x19   : > { %173 = vst [vmem:[%s151_s29] sm:$0xf] (%p80_p4), %v172_v0  ;;  %175 = vst [vmem:[%s151_s29 + $0x4] sm:$0xf] (%p80_p4), %v174_v1  ;;  %v178_v3 = vld [vmem:[%s848_s28 + $0x18] sm:$0xf] (%p80_p4) }
  0x1a   : > { %v180_v4 = vld [vmem:[%s848_s28 + $0x20] sm:$0xf] (%p80_p4)  ;;  %177 = vst [vmem:[%s151_s29 + $0x8] sm:$0xf] (%p80_p4), %v176_v2  ;;  %179 = vst [vmem:[%s151_s29 + $0xc] sm:$0xf] (%p80_p4), %v178_v3 }
  0x1b   : > { %181 = vst [vmem:[%s151_s29 + $0x10] sm:$0xf] (%p80_p4), %v180_v4  ;;  %v182_v5 = vld [vmem:[%s848_s28 + $0x28] sm:$0xf] (%p80_p4)  ;;  %v184_v6 = vld [vmem:[%s848_s28 + $0x30] sm:$0xf] (%p80_p4) }
  0x1c   : > { %v186_v7 = vld [vmem:[%s848_s28 + $0x38] sm:$0xf]  ;;  %183 = vst [vmem:[%s151_s29 + $0x14] sm:$0xf] %v182_v5  ;;  %185 = vst [vmem:[%s151_s29 + $0x18] sm:$0xf] %v184_v6 }
  0x1d   : > { %187 = vst [vmem:[%s151_s29 + $0x1c] sm:$0xf] %v186_v7  ;;  %v188_v8 = vld [vmem:[%s848_s28 + $0x40] sm:$0xf]  ;;  %v190_v9 = vld [vmem:[%s848_s28 + $0x48] sm:$0xf] }
  0x1e   : > { %v192_v10 = vld [vmem:[%s848_s28 + $0x50] sm:$0xf]  ;;  %189 = vst [vmem:[%s151_s29 + $0x20] sm:$0xf] %v188_v8  ;;  %191 = vst [vmem:[%s151_s29 + $0x24] sm:$0xf] %v190_v9 }
  0x1f   : > { %193 = vst [vmem:[%s151_s29 + $0x28] sm:$0xf] %v192_v10  ;;  %v194_v11 = vld [vmem:[%s848_s28 + $0x58] sm:$0xf]  ;;  %v196_v12 = vld [vmem:[%s848_s28 + $0x60] sm:$0xf] }
  0x20   : > { %v198_v13 = vld [vmem:[%s848_s28 + $0x68] sm:$0xf]  ;;  %195 = vst [vmem:[%s151_s29 + $0x2c] sm:$0xf] %v194_v11  ;;  %197 = vst [vmem:[%s151_s29 + $0x30] sm:$0xf] %v196_v12 }
  0x21   : > { %199 = vst [vmem:[%s151_s29 + $0x34] sm:$0xf] %v198_v13  ;;  %v200_v14 = vld [vmem:[%s848_s28 + $0x70] sm:$0xf]  ;;  %v202_v15 = vld [vmem:[%s848_s28 + $0x78] sm:$0xf] }
  0x22   : > { %201 = vst [vmem:[%s151_s29 + $0x38] sm:$0xf] %v200_v14  ;;  %203 = vst [vmem:[%s151_s29 + $0x3c] sm:$0xf] %v202_v15 }
  0x23 PF: > { %p577_p11 = scmp.ge.s32.totalorder %s762_s14, 1  ;;  %p257_p12 = scmp.lt.s32.totalorder %s762_s14, 3 }
  0x25   : > { %p258_p13 = pnand %p577_p11, %p257_p12 }
  0x26   : > { %s869_s30 = sand.u32 (!%p258_p13), 1, %s746_s10   ;;  %v764_v16 = vmov (!%p258_p13), 0.0   ;;  %vm765_vm0 = vmmov (!%p258_p13), 0   ;;  %v766_v20 = vmov (!%p258_p13), 0   ;;  %v683_v58 = vld [vmem:[%s949_s0] sm:$0xff] (!%p258_p13)   ;;  %s590_s16 = sshll.u32 (!%p258_p13), %s754_s12, 7 }
  0x27   : > { %261 = sbr.rel (%p258_p13) target bundleno = 307 (0x133), region = 65  ;;  %602 = vmatprep.subr.bf16.mxu0 (!%p258_p13), %v764_v16  ;;  %s578_s3 = sshll.u32 (!%p258_p13), %s869_s30, 6  ;;  %618 = vmatprep.mubr.msk.bf16.mxu0 (!%p258_p13), %vm765_vm0, %v764_v16 }
  0x28   : > { %s872_s4 = scalar_lea.vmem (!%p258_p13), [#allocation3], %s578_s3  ;;  %s579_s7 = sshll.u32 (!%p258_p13), %s869_s30, 4 }
  0x29   : > { %v315_v17 = vld [vmem:[%s872_s4] sm:$0xf] (!%p258_p13)  ;;  %v316_v18 = vld [vmem:[%s872_s4 + $0x4] sm:$0xf] (!%p258_p13)  ;;  %v317_v19 = vld [vmem:[%s872_s4 + $0x8] sm:$0xf] (!%p258_p13)  ;;  %s900_s23 = scalar_lea.hbm (!%p258_p13), %s951_s2, %s590_s16 }
  0x2a   : > { %v331_v21 = vmax.bf16 (!%p258_p13), %v766_v20, %v315_v17  ;;  %v332_v22 = vmax.bf16 (!%p258_p13), %v766_v20, %v316_v18  ;;  %v318_v23 = vld [vmem:[%s872_s4 + $0xc] sm:$0xf] (!%p258_p13)  ;;  %v333_v24 = vmax.bf16 (!%p258_p13), %v766_v20, %v317_v19  ;;  %v319_v26 = vld [vmem:[%s872_s4 + $0x10] sm:$0xf] (!%p258_p13)  ;;  %v320_v27 = vld [vmem:[%s872_s4 + $0x14] sm:$0xf] (!%p258_p13) }
  0x2b   : > { %v334_v25 = vmax.bf16 (!%p258_p13), %v766_v20, %v318_v23  ;;  %v335_v30 = vmax.bf16 (!%p258_p13), %v766_v20, %v319_v26  ;;  %v336_v31 = vmax.bf16 (!%p258_p13), %v766_v20, %v320_v27  ;;  %v321_v32 = vld [vmem:[%s872_s4 + $0x18] sm:$0xf] (!%p258_p13)  ;;  %v322_v33 = vld [vmem:[%s872_s4 + $0x1c] sm:$0xf] (!%p258_p13)  ;;  %v323_v37 = vld [vmem:[%s872_s4 + $0x20] sm:$0xf] (!%p258_p13) }
  0x2c   : > { %v581_v28 = vcombine.low (!%p258_p13), %v331_v21, %v332_v22  ;;  %v337_v35 = vmax.bf16 (!%p258_p13), %v766_v20, %v321_v32  ;;  %v338_v36 = vmax.bf16 (!%p258_p13), %v766_v20, %v322_v33  ;;  %v324_v38 = vld [vmem:[%s872_s4 + $0x24] sm:$0xf] (!%p258_p13)  ;;  %v339_v40 = vmax.bf16 (!%p258_p13), %v766_v20, %v323_v37  ;;  %v325_v42 = vld [vmem:[%s872_s4 + $0x28] sm:$0xf] (!%p258_p13)  ;;  %v326_v43 = vld [vmem:[%s872_s4 + $0x2c] sm:$0xf] (!%p258_p13) }
  0x2d   : > { %v582_v29 = vcombine.low (!%p258_p13), %v333_v24, %v334_v25  ;;  %v583_v34 = vcombine.low (!%p258_p13), %v335_v30, %v336_v31  ;;  %v340_v41 = vmax.bf16 (!%p258_p13), %v766_v20, %v324_v38  ;;  %v341_v45 = vmax.bf16 (!%p258_p13), %v766_v20, %v325_v42  ;;  %v327_v47 = vld [vmem:[%s872_s4 + $0x30] sm:$0xf] (!%p258_p13)  ;;  %v328_v48 = vld [vmem:[%s872_s4 + $0x34] sm:$0xf] (!%p258_p13)  ;;  %v329_v52 = vld [vmem:[%s872_s4 + $0x38] sm:$0xf] (!%p258_p13) }
  0x2e   : > { %603 = vmatpush3.bf16.msra.mxu0 %v581_v28  ;;  %v584_v39 = vcombine.low %v337_v35, %v338_v36  ;;  %v342_v46 = vmax.bf16 %v766_v20, %v326_v43  ;;  %v343_v50 = vmax.bf16 %v766_v20, %v327_v47  ;;  %v344_v51 = vmax.bf16 %v766_v20, %v328_v48  ;;  %v330_v53 = vld [vmem:[%s872_s4 + $0x3c] sm:$0xf]  ;;  %s292_s8 = scalar_lea.vmem [#allocation4], %s579_s7  ;;  %s454_s24 = scalar_lea.sflag [#allocation5], %s869_s30 }
  0x2f   : > { %604 = vmatprep.subr.bf16.mxu0 %v764_v16  ;;  %v585_v44 = vcombine.low %v339_v40, %v340_v41  ;;  %v345_v55 = vmax.bf16 %v766_v20, %v329_v52  ;;  %v346_v56 = vmax.bf16 %v766_v20, %v330_v53  ;;  %s469_s15 = sshll.u32 %s292_s8, 4  ;;  %s767_s12 = smov [#allocation4]   ;;  %s895_s15 = int_to_ptr.vmem [resolvable:$true] %s469_s15 }
  0x30   : > { %v586_v49 = vcombine.low %v341_v45, %v342_v46  ;;  %v587_v54 = vcombine.low %v343_v50, %v344_v51  ;;  %s684_s25 = scalar_lea.vmem %s895_s15, 256  ;;  %s688_s26 = sshll.u32 %s767_s12, 4  ;;  %s689_s26 = int_to_ptr.vmem [resolvable:$false] %s688_s26 }
  0x31   : > { %v588_v57 = vcombine.low %v345_v55, %v346_v56  ;;  %p685_p0 = scmp.ne.s32.totalorder %s895_s15, %s684_s25  ;;  %s690_s27 = scalar_lea.vmem %s689_s26, 512 }
  0x32   : > { %605 = vmatpush3.bf16.msra.mxu0 %v582_v29  ;;  %p691_p3 = scmp.lt.s32.totalorder %s895_s15, %s689_s26  ;;  %p692_p4 = scmp.lt.s32.totalorder %s690_s27, %s684_s25 }
  0x33   : > { %606 = vmatprep.subr.bf16.mxu0 %v764_v16  ;;  %p686_p1 = pnand %p685_p0, %p825_p5 }
  0x34   : > { %p693_p6 = por %p692_p4, %p691_p3 }
  0x35   : > { %p687_p2 = pneg %p686_p1 }
  0x36   : > { %607 = vmatpush3.bf16.msra.mxu0 %v583_v34 }
  0x37   : > { %608 = vmatprep.subr.bf16.mxu0 %v764_v16  ;;  %p694_p7 = pnand %p693_p6, %p687_p2 }
  0x3a   : > { %609 = vmatpush3.bf16.msra.mxu0 %v584_v39 }
  0x3b   : > { %610 = vmatprep.subr.bf16.mxu0 %v764_v16 }
  0x3e   : > { %611 = vmatpush3.bf16.msra.mxu0 %v585_v44 }
  0x3f   : > { %612 = vmatprep.subr.bf16.mxu0 %v764_v16 }
  0x42   : > { %613 = vmatpush3.bf16.msra.mxu0 %v586_v49 }
  0x43   : > { %614 = vmatprep.subr.bf16.mxu0 %v764_v16 }
  0x46   : > { %615 = vmatpush3.bf16.msra.mxu0 %v587_v54 }
  0x47   : > { %616 = vmatprep.subr.bf16.mxu0 %v764_v16 }
  0x4a   : > { %617 = vmatpush3.bf16.msra.mxu0 %v588_v57 }
  0x4d   : > { %619 = vmatmul.mubr.bf16.vlgmr.msra.gmra.mrb[0].mxu0 %v683_v58 }
 0x120   : > { %v435_v59 = vpop.f32.mrb[0].mxu0 }
 0x121   : > { %451 = vst [vmem:[%s292_s8] sm:$0xff] %v435_v59  ;;  %v620_v60 = vpop.f32.mrb[1].mxu0 }
 0x122   : > { %v438_v61 = vpop.f32.mrb[2].mxu0 }
 0x123   : > { %452 = vst [vmem:[%s292_s8 + $0x8] sm:$0xff] %v438_v61  ;;  %v621_v62 = vpop.f32.mrb[3].mxu0 }
 0x124   : > { %697 = shalt.err (!%p694_p7)
}
 0x125   : > { %s698_s28 = scalar_lea.hbm %s900_s23, 256  ;;  %s702_s4 = scalar_lea.hbm %s951_s2, 512 }
 0x126   : > { %p699_p8 = scmp.ne.s32.totalorder %s900_s23, %s698_s28  ;;  %p703_p13 = scmp.lt.u32.totalorder %s900_s23, %s951_s2 }
 0x127   : > { %p704_p0 = scmp.lt.u32.totalorder %s702_s4, %s698_s28  ;;  %p706_p2 = scmp.lt.u32.totalorder %s698_s28, %s900_s23 }
 0x128   : > { %p700_p11 = pnand %p699_p8, %p825_p5 }
 0x129   : > { %p705_p1 = por %p704_p0, %p703_p13 }
 0x12a   : > { %p701_p12 = pneg %p700_p11 }
 0x12b   : > { %p707_p3 = por %p706_p2, %p705_p1 }
 0x12d   : > { %p708_p4 = pnand %p707_p3, %p701_p12 }
 0x12f   : > { %711 = shalt.err (!%p708_p4)
}
 0x130   : > { %s768_s7 = smov 128   ;;  %s769_s8 = smov 256  }
 0x131   : > { %s770_s16 = smov 8  }
 0x132   : > { %622 = dma.vmem_to_hbm [thread:$0]  (%p825_p5), %s895_s15, 256, %s900_s23, %s454_s24, %s768_s7, %s769_s8, %s770_s16  }
 0x133 PF: > { %s484_s18 = sand.u32 1, %s742_s9   ;;  %p625_p6 = pnand %p574_p10, %p836_p9 }
 0x134   : > { %s485_s20 = scalar_lea.sflag [#allocation5], %s484_s18 }
 0x135   : > { %737 = dma.done.wait (!%p625_p6), %s485_s20, 256  }
 0x136   : > { %739 = vsyncadd (!%p625_p6), %s485_s20, 4294967040  ;;  %s15_s14 = sadd.s32 1, %s762_s14   ;;  %s954_s9 = smov %s746_s10 }
 0x137   : > { %p12_p7 = scmp.ge.s32.totalorder %s15_s14, 4   ;;  %s955_s10 = smov %s750_s11 }
 0x138   : > { %s956_s11 = smov %s834_s21  ;;  %s957_s12 = smov %s758_s13 }
 0x139   : > { %s958_s13 = smov %s960_s17  ;;  %14 = sbr.rel (!%p12_p7) target bundleno = 4 (0x4), region = 120 }
 0x140   :  { %490 = vsyncpa [#allocation5], 1 }
 0x141   :  { %492 = vsyncpa [#allocation5 + $0x1], 1 }

</bundles_post_ra>
